<compile_context>
chip_gen: v7x
topology: tpu7x:2x2x1
jax: 0.10.0
libtpu: 0.0.40
codegen_flags: <defaults>
</compile_context>

<pallas_src>
import functools

import jax
import jax.numpy as jnp
from jax.experimental import pallas as pl
from jax.experimental.pallas import tpu as pltpu

_SUBLANE = 8     # sublane width (second-to-last dim alignment)


def _round_up(n, m):
    return ((n + m - 1) // m) * m


def _cdiv(a, b):
    return -(-a // b)


def _activation(y, name):
    # Mirrors get_activation(); only 'relu' is exercised by the chosen config.
    if name == "relu":
        return jnp.maximum(y, 0.0)
    if name == "leaky_relu":
        return jnp.where(y >= 0.0, y, 0.01 * y)          # nn.LeakyReLU default slope
    if name == "softplus":
        return jnp.logaddexp(y, 0.0)                      # nn.Softplus(beta=1)
    raise ValueError(f"unknown activation {name!r}")


def _mlp_fused_kernel(*refs, n_layers, activation):
    """refs = (x_ref, w1_ref, b1_ref, ..., wL_ref, bL_ref, o_ref).

    One batch tile flows through all layers inside a single grid step; the
    intermediates are staged in vregs/VMEM by the compiler and never touch HBM.
    Only x is read from HBM and only the final (bn, d_out) tile is written.
    """
    x_ref = refs[0]
    o_ref = refs[-1]
    h = x_ref[...].astype(jnp.float32)
    for k in range(n_layers):                                 # static unroll over layers
        w = refs[1 + 2 * k][...]                              # (in_k, out_k), true width
        b = refs[2 + 2 * k][...]                              # (1, out_k)   -> broadcast
        h = jnp.dot(h, w, preferred_element_type=jnp.float32)  # MXU
        h = _activation(h + b, activation)                      # VPU (+EUP for softplus)
    o_ref[...] = h.astype(o_ref.dtype)


def prepare_params(params):
    """One-time conversion of PyTorch-layout params to kernel layout.

    (w_pt (out, in), b (out,)) -> (w (in, out), b (1, out)).  No lane padding:
    true feature widths (16/32/8) are used directly, so nothing is transposed,
    padded or sliced per forward call.
    """
    prepared = []
    for w_pt, b in params:
        prepared.append((jnp.asarray(w_pt).T, jnp.asarray(b).reshape(1, -1)))
    return prepared


def mlp_forward(x, prepared_params, activation="relu", block_n=1024):
    """Fused forward pass of MLP(d_hidden, 'relu', bn=False, linear_first=True).

    x:               (N, d_hidden[0]) float32
    prepared_params: output of prepare_params(): list of (w (in,out), b (1,out))
    """
    N, f_in = x.shape
    d_out = prepared_params[-1][0].shape[1]

    # Balanced, sublane-aligned batch tiles.  Force >=2 grid steps when the
    # batch permits so the "parallel" axis actually spans both v7x TensorCores.
    num_tiles = max(1, _cdiv(N, block_n))
    if num_tiles < 2 and N > _SUBLANE:
        num_tiles = 2
    bn = _round_up(_cdiv(N, num_tiles), _SUBLANE)
    n_pad = _round_up(N, bn)

    # Only the batch axis is ever padded (zero rows, sliced off at the end).
    x_p = x if n_pad == N else jnp.pad(x, ((0, n_pad - N), (0, 0)))

    operands = [x_p]
    in_specs = [pl.BlockSpec((bn, f_in), lambda i: (i, 0))]
    for w, b in prepared_params:
        operands += [w, b]
        in_specs += [
            pl.BlockSpec(w.shape, lambda i: (0, 0)),   # whole weight, resident per step
            pl.BlockSpec(b.shape, lambda i: (0, 0)),   # whole bias row
        ]

    kernel = functools.partial(
        _mlp_fused_kernel, n_layers=len(prepared_params), activation=activation
    )
    out_p = pl.pallas_call(
        kernel,
        out_shape=jax.ShapeDtypeStruct((n_pad, d_out), x.dtype),
        grid_spec=pl.GridSpec(
            grid=(n_pad // bn,),
            in_specs=in_specs,
            out_specs=pl.BlockSpec((bn, d_out), lambda i: (i, 0)),
        ),
        compiler_params=pltpu.CompilerParams(
            dimension_semantics=("parallel",),          # batch tiles are independent
            vmem_limit_bytes=32 * 1024 * 1024,          # per-step footprint is ~MiB-scale
        ),
    )(*operands)

    # Slice off the (zero) batch-padding rows only; no lane slicing needed.
    return out_p if n_pad == N else out_p[:N]


def init_mlp_params(key, d_hidden):
    """nn.Linear-style init: weight (out, in), bias (out,), U(-1/sqrt(fan_in), ...)."""
    params = []
    for i in range(1, len(d_hidden)):
        fan_in, fan_out = d_hidden[i - 1], d_hidden[i]
        key, kw, kb = jax.random.split(key, 3)
        bound = 1.0 / float(fan_in) ** 0.5
        w_pt = jax.random.uniform(kw, (fan_out, fan_in), jnp.float32, -bound, bound)
        b = jax.random.uniform(kb, (fan_out,), jnp.float32, -bound, bound)
        params.append((w_pt, b))
    return params


def mlp_reference(x, params, activation="relu"):
    # Pure-JAX reference mirroring the PyTorch module: relu(x @ W.T + b) per layer.
    for w_pt, b in params:
        x = _activation(x @ w_pt.T + b, activation)
    return x


if __name__ == "__main__":
    d_hidden = [16, 32, 8]
    batch = 8
    activation = "relu"

    key = jax.random.PRNGKey(0)
    key_x, key_x2, key_p = jax.random.split(key, 3)
    x = jax.random.normal(key_x, (batch, d_hidden[0]), dtype=jnp.float32)
    params = init_mlp_params(key_p, d_hidden)
    prepared = prepare_params(params)          # one-time layout prep (hoisted)

    # Small-batch path: single (8, 16) tile, single grid step.
    out = mlp_forward(x, prepared, activation)
    jax.block_until_ready(out)
    ref = mlp_reference(x, params, activation)
    assert out.shape == (batch, d_hidden[-1])
    assert bool(jnp.all(out >= 0.0))                              # ReLU sanity
    assert bool(jnp.allclose(out, ref, rtol=1e-5, atol=1e-5))     # matches module math

    # Mid-batch path: exercises balanced tiling (>=2 grid steps) + row padding.
    x2 = jax.random.normal(key_x2, (200, d_hidden[0]), dtype=jnp.float32)
    out2 = mlp_forward(x2, prepared, activation)
    jax.block_until_ready(out2)
    ref2 = mlp_reference(x2, params, activation)
    assert out2.shape == (200, d_hidden[-1])
    assert bool(jnp.allclose(out2, ref2, rtol=1e-5, atol=1e-5))

    print("KERNEL_OK")
</pallas_src>

<mosaic_0001>
module attributes {stable_mosaic.version = 11 : i64} {
  func.func @_mlp_fused_kernel(%arg0: i32, %arg1: memref<8x16xf32, #tpu.memory_space<vmem>>, %arg2: memref<16x32xf32, #tpu.memory_space<vmem>>, %arg3: memref<1x32xf32, #tpu.memory_space<vmem>>, %arg4: memref<32x8xf32, #tpu.memory_space<vmem>>, %arg5: memref<1x8xf32, #tpu.memory_space<vmem>>, %arg6: memref<8x8xf32, #tpu.memory_space<vmem>>) attributes {dimension_semantics = [#tpu.dimension_semantics<parallel>], iteration_bounds = array<i64: 1>, scalar_prefetch = 0 : i64, scratch_operands = 0 : i64, tpu.core_type = #tpu.core_type<tc>, window_params = [{transform_indices = @transform_0, window_bounds = array<i64: 8, 16>}, {pipeline_mode = #tpu.pipeline_mode<synchronous>, transform_indices = @transform_1, window_bounds = array<i64: 16, 32>}, {pipeline_mode = #tpu.pipeline_mode<synchronous>, transform_indices = @transform_2, window_bounds = array<i64: 1, 32>}, {pipeline_mode = #tpu.pipeline_mode<synchronous>, transform_indices = @transform_3, window_bounds = array<i64: 32, 8>}, {pipeline_mode = #tpu.pipeline_mode<synchronous>, transform_indices = @transform_4, window_bounds = array<i64: 1, 8>}, {transform_indices = @transform_5, window_bounds = array<i64: 8, 8>}]} {
    %c0 = arith.constant 0 : index
    %c0_0 = arith.constant 0 : index
    %0 = vector.load %arg1[%c0, %c0_0] : memref<8x16xf32, #tpu.memory_space<vmem>>, vector<8x16xf32>
    %c0_1 = arith.constant 0 : index
    %c0_2 = arith.constant 0 : index
    %1 = vector.load %arg2[%c0_1, %c0_2] : memref<16x32xf32, #tpu.memory_space<vmem>>, vector<16x32xf32>
    %c0_3 = arith.constant 0 : index
    %c0_4 = arith.constant 0 : index
    %2 = vector.load %arg3[%c0_3, %c0_4] : memref<1x32xf32, #tpu.memory_space<vmem>>, vector<1x32xf32>
    %cst = arith.constant dense<0.000000e+00> : vector<8x32xf32>
    %3 = tpu.matmul %0, %1, %cst {dimension_numbers = #tpu.dot_dimension_numbers<[1], [0], [0], [1], [0, 0, 1, 1], [], []>} : vector<8x16xf32>, vector<16x32xf32>, vector<8x32xf32> -> vector<8x32xf32>
    %4 = vector.broadcast %2 : vector<1x32xf32> to vector<8x32xf32>
    %5 = arith.addf %3, %4 : vector<8x32xf32>
    %cst_5 = arith.constant 0.000000e+00 : f32
    %6 = vector.broadcast %cst_5 : f32 to vector<8x32xf32>
    %7 = arith.maximumf %5, %6 : vector<8x32xf32>
    %c0_6 = arith.constant 0 : index
    %c0_7 = arith.constant 0 : index
    %8 = vector.load %arg4[%c0_6, %c0_7] : memref<32x8xf32, #tpu.memory_space<vmem>>, vector<32x8xf32>
    %c0_8 = arith.constant 0 : index
    %c0_9 = arith.constant 0 : index
    %9 = vector.load %arg5[%c0_8, %c0_9] : memref<1x8xf32, #tpu.memory_space<vmem>>, vector<1x8xf32>
    %cst_10 = arith.constant dense<0.000000e+00> : vector<8x8xf32>
    %10 = tpu.matmul %7, %8, %cst_10 {dimension_numbers = #tpu.dot_dimension_numbers<[1], [0], [0], [1], [0, 0, 1, 1], [], []>} : vector<8x32xf32>, vector<32x8xf32>, vector<8x8xf32> -> vector<8x8xf32>
    %11 = vector.broadcast %9 : vector<1x8xf32> to vector<8x8xf32>
    %12 = arith.addf %10, %11 : vector<8x8xf32>
    %cst_11 = arith.constant 0.000000e+00 : f32
    %13 = vector.broadcast %cst_11 : f32 to vector<8x8xf32>
    %14 = arith.maximumf %12, %13 : vector<8x8xf32>
    %c0_12 = arith.constant 0 : index
    %c0_13 = arith.constant 0 : index
    %15 = vector.load %arg6[%c0_12, %c0_13] : memref<8x8xf32, #tpu.memory_space<vmem>>, vector<8x8xf32>
    tpu.vector_store %arg6[%c0_12, %c0_13], %14 {strides = array<i32>} : memref<8x8xf32, #tpu.memory_space<vmem>>, vector<8x8xf32>,
    return
  }
  func.func @transform_0(%arg0: i32) -> (i32, i32) {
    %c0_i32 = arith.constant 0 : i32
    %c0_i32_0 = arith.constant 0 : i32
    return %arg0, %c0_i32 : i32, i32
  }
  func.func @transform_1(%arg0: i32) -> (i32, i32) {
    %c0_i32 = arith.constant 0 : i32
    %c0_i32_0 = arith.constant 0 : i32
    %c0_i32_1 = arith.constant 0 : i32
    return %c0_i32, %c0_i32_0 : i32, i32
  }
  func.func @transform_2(%arg0: i32) -> (i32, i32) {
    %c0_i32 = arith.constant 0 : i32
    %c0_i32_0 = arith.constant 0 : i32
    %c0_i32_1 = arith.constant 0 : i32
    return %c0_i32, %c0_i32_0 : i32, i32
  }
  func.func @transform_3(%arg0: i32) -> (i32, i32) {
    %c0_i32 = arith.constant 0 : i32
    %c0_i32_0 = arith.constant 0 : i32
    %c0_i32_1 = arith.constant 0 : i32
    return %c0_i32, %c0_i32_0 : i32, i32
  }
  func.func @transform_4(%arg0: i32) -> (i32, i32) {
    %c0_i32 = arith.constant 0 : i32
    %c0_i32_0 = arith.constant 0 : i32
    %c0_i32_1 = arith.constant 0 : i32
    return %c0_i32, %c0_i32_0 : i32, i32
  }
  func.func @transform_5(%arg0: i32) -> (i32, i32) {
    %c0_i32 = arith.constant 0 : i32
    %c0_i32_0 = arith.constant 0 : i32
    return %arg0, %c0_i32 : i32, i32
  }
}

</mosaic_0001>

<bundles_post_ra>
// kernel: tpu_custom_call.1
= control target key start
LH: loop header
LB: loop body
LE: loop exit
PB: predicated region body
PF: predicated region fallthrough
CT: control target
= control target key end

     0   :  { %v275_v2 = vmov 0.0|0.0   ;;  %vm276_vm0 = vmmov 0   ;;  %v277_v4 = vmov 0.0   ;;  %s348_s0 = inlined_call_operand.vmem [shape: f32[8,16], index: 0, kind: input, shape index: {}]   ;;  %s349_s1 = inlined_call_operand.vmem [shape: f32[16,32], index: 1, kind: input, shape index: {}]   ;;  %s350_s2 = inlined_call_operand.vmem [shape: f32[1,32], index: 2, kind: input, shape index: {}]   ;;  %s351_s3 = inlined_call_operand.vmem [shape: f32[32,8], index: 3, kind: input, shape index: {}]   ;;  %s352_s4 = inlined_call_operand.vmem [shape: f32[1,8], index: 4, kind: input, shape index: {}]   ;;  %s353_s5 = inlined_call_operand.hbm [shape: f32[8,8], index: 5, kind: output, shape index: {}]  }
   0x1   :  { %v22_v0 = vld [vmem:[%s349_s1] sm:$0xff]  ;;  %v23_v1 = vld [vmem:[%s349_s1 + $0x8] sm:$0xff]  ;;  %238 = vmatprep.subr.bf16.mxu0 %v275_v2  ;;  %224 = vmatprep.mubr.msk.f32.mxu0 %vm276_vm0, %v277_v4 }
   0x2   :  { %v239_v3 = vpack.c.bf16 %v23_v1, %v22_v0  ;;  %v106_v5 = vld [vmem:[%s351_s3] sm:$0xff]  ;;  %v107_v6 = vld [vmem:[%s351_s3 + $0x8] sm:$0xff]  ;;  %241 = vmatprep.subr.bf16.mxu1 %v275_v2  ;;  %235 = vmatprep.mubr.msk.f32.mxu1 %vm276_vm0, %v277_v4 }
   0x3   :  { %v242_v7 = vpack.c.bf16 %v107_v6, %v106_v5 }
   0x4   :  { %10 = vsyncpa [#allocation3], 0  ;;  %240 = vmatpush3.bf16.msra.mxu0 %v239_v3  ;;  %v21_v8 = vld [vmem:[%s348_s0] sm:$0xff]  ;;  %vm31_vm1 = vcmask 130048   ;;  %v108_v9 = vld [vmem:[%s351_s3 + $0x10] sm:$0xff]  ;;  %vm117_vm2 = vcmask 261120  }
   0x5   :  { %243 = vmatpush3.bf16.msra.mxu1 %v242_v7  ;;  %v109_v10 = vld [vmem:[%s351_s3 + $0x18] sm:$0xff]  ;;  %v208_v12 = vld [vmem:[%s350_s2] ss:$0 sm:$0xff]  ;;  %s278_s9 = smov [#allocation2]   ;;  %vm192_vm3 = vcmask 64512  }
   0x6   :  { %244 = vmatprep.subr.bf16.mxu1 %v275_v2  ;;  %v245_v11 = vpack.c.bf16 %v109_v10, %v108_v9  ;;  %v210_v17 = vld [vmem:[%s352_s4] ss:$0 sm:$0xff]  ;;  %s200_s10 = sshll.u32 %s278_s9, 4  ;;  %s201_s10 = int_to_ptr.vmem [resolvable:$true] %s200_s10 }
   0x7   :  { %225 = vmatmul.mubr.msk.f32.vlgmr.msra.gmra.mrb[0].mxu0 %vm31_vm1, %v21_v8  ;;  %s251_s2 = scalar_lea.vmem %s201_s10, 128  ;;  %p256_p1 = scmp.lt.s32.totalorder %s201_s10, %s201_s10 }
   0x8   :  { %p252_p0 = scmp.ne.s32.totalorder %s201_s10, %s251_s2  ;;  %p257_p2 = scmp.lt.s32.totalorder %s251_s2, %s251_s2 }
   0x9   :  { %246 = vmatpush3.bf16.msra.mxu1 %v245_v11 }
   0xa   :  { %p258_p3 = por %p257_p2, %p256_p1 }
   0xc   :  { %p259_p4 = pnand %p258_p3, %p252_p0 }
  0xda   :  { %v101_v13 = vpop.f32.mrb[0].mxu0 }
  0xdb   :  { %v102_v14 = vadd.f32 %v208_v12, %v101_v13  ;;  %v226_v15 = vpop.f32.mrb[1].mxu0 }
  0xdd   :  { %v105_v16 = vmax.f32 %v102_v14, 0.0 }
  0xdf   :  { %236 = vmatmul.mubr.msk.f32.vlgmr.msra.gmra.mrb[0].mxu1 %vm117_vm2, %v105_v16 }
 0x1b2   :  { %v187_v18 = vpop.f32.mrb[0].mxu1 }
 0x1b3   :  { %v188_v19 = vadd.f32 %v210_v17, %v187_v18  ;;  %v237_v20 = vpop.f32.mrb[1].mxu1 }
 0x1b5   :  { %v191_v21 = vmax.f32 %v188_v19, 0.0 }
 0x1b7   :  { %193 = vst.msk [vmem:[#allocation2] sm:$0xff] %vm192_vm3, %v191_v21 }
 0x1b8   :  { %262 = shalt.err (!%p259_p4)
}
 0x1b9   :  { %s263_s4 = scalar_lea.hbm %s353_s5, 128 }
 0x1ba   :  { %p264_p5 = scmp.ne.s32.totalorder %s353_s5, %s263_s4  ;;  %p267_p6 = scmp.lt.u32.totalorder %s263_s4, %s353_s5 }
 0x1bc   :  { %p269_p7 = pnand %p267_p6, %p264_p5 }
 0x1be   :  { %272 = shalt.err (!%p269_p7)
}
 0x1bf   :  { %203 = dma.vmem_to_hbm [thread:$0]  %s201_s10, 128, %s353_s5, [#allocation3]  }
 0x1c0   :  { %273 = dma.done.wait [#allocation3], 128  }
 0x1c1   :  { %274 = vsyncadd [#allocation3], 4294967168 }
 0x1c2   :  { %207 = vsyncpa [#allocation3], 1 }

</bundles_post_ra>
